<compile_context>
chip_gen: v6e
topology: v6e:2x2x1
jax: 0.10.0
libtpu: 0.0.40
codegen_flags: <defaults>
</compile_context>

<pallas_src>
import jax
import jax.numpy as jnp
import numpy as np
from jax import lax
from jax.experimental import pallas as pl
from jax.experimental.pallas import tpu as pltpu


def ucb_kernel(x_ref, wmu_ref, wvar_ref, avg_ref, out_ref):
    """One grid step == one lane-dense tile of TN test points (all models at once).

    x_ref   : (TN, D+1)   test points, bias column of ones appended
    wmu_ref : (M, D+1)    sample-averaged mean-head weights (bias folded)
    wvar_ref: (M*S, D+1)  stacked variance-head weights (bias folded)
    avg_ref : (M, M*S)    block-diagonal (beta/cost_m)/S averaging matrix
    out_ref : (M, TN)
    """
    x = x_ref[...]
    dn = (((1,), (1,)), ((), ()))  # contract the feature dim of both operands

    # Mean head: already averaged over the S samples in the wrapper (exact).
    mu = lax.dot_general(wmu_ref[...], x, dn,
                         preferred_element_type=jnp.float32)        # (M, TN)

    # Variance head: one tall matmul for all models * samples.
    raw = lax.dot_general(wvar_ref[...], x, dn,
                          preferred_element_type=jnp.float32)       # (M*S, TN)
    std = jnp.sqrt(raw * raw + 1e-6)                                # (M*S, TN)

    # beta/cost_m * mean_over_samples(std), via one tiny resident matmul.
    ucb = jnp.dot(avg_ref[...], std,
                  preferred_element_type=jnp.float32)               # (M, TN)

    out_ref[...] = mu + ucb


def ucb_naive_pallas(test_x, wmu, bmu, wvar, bvar, costs, beta, *,
                     compute_dtype=jnp.bfloat16, tn=512):
    """test_x: [N, D]; wmu/wvar: [M, S, D]; bmu/bvar: [M, S]; costs: [M]."""
    N, D = test_x.shape
    M, S, _ = wmu.shape

    # Lane-dense tile width: multiple of 128, capped by the padded N extent.
    tn = max(128, (tn // 128) * 128)
    TN = min(tn, pl.cdiv(N, 128) * 128)
    N_pad = pl.cdiv(N, TN) * TN
    n_tiles = N_pad // TN

    # test_x with a ones column (bias folding), zero-padded along N, cast.
    x_aug = jnp.concatenate(
        [jnp.asarray(test_x, jnp.float32), jnp.ones((N, 1), jnp.float32)],
        axis=1)
    x_aug = jnp.pad(x_aug, ((0, N_pad - N), (0, 0))).astype(compute_dtype)

    # Mean head: sample-mean is linear -> fold it here (exact). (M, D+1)
    wmu_aug = jnp.concatenate(
        [jnp.mean(jnp.asarray(wmu, jnp.float32), axis=1),
         jnp.mean(jnp.asarray(bmu, jnp.float32), axis=1, keepdims=True)],
        axis=1).astype(compute_dtype)

    # Variance head: stack all models' samples into one slab. (M*S, D+1)
    wvar_aug = jnp.concatenate(
        [jnp.asarray(wvar, jnp.float32).reshape(M * S, D),
         jnp.asarray(bvar, jnp.float32).reshape(M * S, 1)],
        axis=1).astype(compute_dtype)

    # (beta / cost_m) / S block-diagonal averaging matrix. (M, M*S), kept f32.
    scale = beta / jnp.asarray(costs, jnp.float32)                  # (M,)
    avg = (jnp.repeat(jnp.eye(M, dtype=jnp.float32), S, axis=1)
           * (scale[:, None] / S))

    out = pl.pallas_call(
        ucb_kernel,
        out_shape=jax.ShapeDtypeStruct((M, N_pad), jnp.float32),
        grid_spec=pltpu.PrefetchScalarGridSpec(
            num_scalar_prefetch=0,
            grid=(n_tiles,),
            in_specs=[
                pl.BlockSpec((TN, D + 1), lambda j: (j, 0)),       # x tile
                pl.BlockSpec((M, D + 1), lambda j: (0, 0)),        # resident
                pl.BlockSpec((M * S, D + 1), lambda j: (0, 0)),    # resident
                pl.BlockSpec((M, M * S), lambda j: (0, 0)),        # resident
            ],
            out_specs=pl.BlockSpec((M, TN), lambda j: (0, j)),
        ),
        compiler_params=pltpu.CompilerParams(
            dimension_semantics=("parallel",)),
    )(x_aug, wmu_aug, wvar_aug, avg)

    return out[:, :N]


def ucb_naive_ref(test_x, wmu, bmu, wvar, bvar, costs, beta):
    """Pure-JAX (f32) reference mirroring the PyTorch forward."""
    M = wmu.shape[0]
    outs = []
    for i in range(M):
        mus = jnp.einsum("sd,nd->sn", wmu[i], test_x) + bmu[i][:, None]
        raw = jnp.einsum("sd,nd->sn", wvar[i], test_x) + bvar[i][:, None]
        vars_ = raw * raw + 1e-6
        res_i = mus + beta * (1.0 / costs[i]) * jnp.sqrt(vars_)
        outs.append(jnp.mean(res_i, axis=0)[None, :])
    return jnp.concatenate(outs, axis=0)


if __name__ == "__main__":
    # M models, S posterior samples, N test points, D features.
    M, S, N, D = 2, 8, 200, 4
    beta = 0.5

    key = jax.random.PRNGKey(0)
    k_x, k_wm, k_bm, k_wv, k_bv = jax.random.split(key, 5)

    test_x = jax.random.normal(k_x, (N, D), dtype=jnp.float32)
    wmu = jax.random.normal(k_wm, (M, S, D), dtype=jnp.float32) * 0.5
    bmu = jax.random.normal(k_bm, (M, S), dtype=jnp.float32) * 0.1
    wvar = jax.random.normal(k_wv, (M, S, D), dtype=jnp.float32) * 0.3
    bvar = jax.random.normal(k_bv, (M, S), dtype=jnp.float32) * 0.1
    costs = jnp.array([1.0, 2.0], dtype=jnp.float32)

    ref = ucb_naive_ref(test_x, wmu, bmu, wvar, bvar, costs, beta)

    # f32 compute path, tn=128 so the grid has 2 lane-dense tiles.
    out_f32 = ucb_naive_pallas(test_x, wmu, bmu, wvar, bvar, costs, beta,
                               compute_dtype=jnp.float32, tn=128)
    out_f32 = jax.block_until_ready(out_f32)
    assert out_f32.shape == (M, N)
    np.testing.assert_allclose(np.asarray(out_f32), np.asarray(ref),
                               rtol=1e-4, atol=1e-4)

    # bf16 operand path (v6e/v7x MXU fast path), f32 accumulation.
    out_bf16 = ucb_naive_pallas(test_x, wmu, bmu, wvar, bvar, costs, beta,
                                compute_dtype=jnp.bfloat16)
    out_bf16 = jax.block_until_ready(out_bf16)
    np.testing.assert_allclose(np.asarray(out_bf16), np.asarray(ref),
                               rtol=5e-2, atol=5e-2)

    print("KERNEL_OK")
</pallas_src>

<mosaic_0001>
module attributes {stable_mosaic.version = 11 : i64} {
  func.func @ucb_kernel(%arg0: i32, %arg1: memref<128x5xf32, #tpu.memory_space<vmem>>, %arg2: memref<2x5xf32, #tpu.memory_space<vmem>>, %arg3: memref<16x5xf32, #tpu.memory_space<vmem>>, %arg4: memref<2x16xf32, #tpu.memory_space<vmem>>, %arg5: memref<2x128xf32, #tpu.memory_space<vmem>>) attributes {dimension_semantics = [#tpu.dimension_semantics<parallel>], iteration_bounds = array<i64: 2>, scalar_prefetch = 0 : i64, scratch_operands = 0 : i64, tpu.core_type = #tpu.core_type<tc>, window_params = [{transform_indices = @transform_0, window_bounds = array<i64: 128, 5>}, {pipeline_mode = #tpu.pipeline_mode<synchronous>, transform_indices = @transform_1, window_bounds = array<i64: 2, 5>}, {pipeline_mode = #tpu.pipeline_mode<synchronous>, transform_indices = @transform_2, window_bounds = array<i64: 16, 5>}, {pipeline_mode = #tpu.pipeline_mode<synchronous>, transform_indices = @transform_3, window_bounds = array<i64: 2, 16>}, {transform_indices = @transform_4, window_bounds = array<i64: 2, 128>}]} {
    %c0 = arith.constant 0 : index
    %c0_0 = arith.constant 0 : index
    %0 = vector.load %arg1[%c0, %c0_0] : memref<128x5xf32, #tpu.memory_space<vmem>>, vector<128x5xf32>
    %c0_1 = arith.constant 0 : index
    %c0_2 = arith.constant 0 : index
    %1 = vector.load %arg2[%c0_1, %c0_2] : memref<2x5xf32, #tpu.memory_space<vmem>>, vector<2x5xf32>
    %cst = arith.constant dense<0.000000e+00> : vector<2x128xf32>
    %2 = tpu.matmul %1, %0, %cst {dimension_numbers = #tpu.dot_dimension_numbers<[1], [1], [0], [0], [0, 0, 1, 0], [], []>} : vector<2x5xf32>, vector<128x5xf32>, vector<2x128xf32> -> vector<2x128xf32>
    %c0_3 = arith.constant 0 : index
    %c0_4 = arith.constant 0 : index
    %3 = vector.load %arg3[%c0_3, %c0_4] : memref<16x5xf32, #tpu.memory_space<vmem>>, vector<16x5xf32>
    %cst_5 = arith.constant dense<0.000000e+00> : vector<16x128xf32>
    %4 = tpu.matmul %3, %0, %cst_5 {dimension_numbers = #tpu.dot_dimension_numbers<[1], [1], [0], [0], [0, 0, 1, 0], [], []>} : vector<16x5xf32>, vector<128x5xf32>, vector<16x128xf32> -> vector<16x128xf32>
    %5 = arith.mulf %4, %4 : vector<16x128xf32>
    %cst_6 = arith.constant 9.99999997E-7 : f32
    %6 = vector.broadcast %cst_6 : f32 to vector<16x128xf32>
    %7 = arith.addf %5, %6 : vector<16x128xf32>
    %8 = math.sqrt %7 : vector<16x128xf32>
    %c0_7 = arith.constant 0 : index
    %c0_8 = arith.constant 0 : index
    %9 = vector.load %arg4[%c0_7, %c0_8] : memref<2x16xf32, #tpu.memory_space<vmem>>, vector<2x16xf32>
    %cst_9 = arith.constant dense<0.000000e+00> : vector<2x128xf32>
    %10 = tpu.matmul %9, %8, %cst_9 {dimension_numbers = #tpu.dot_dimension_numbers<[1], [0], [0], [1], [0, 0, 1, 1], [], []>} : vector<2x16xf32>, vector<16x128xf32>, vector<2x128xf32> -> vector<2x128xf32>
    %11 = arith.addf %2, %10 : vector<2x128xf32>
    %c0_10 = arith.constant 0 : index
    %c0_11 = arith.constant 0 : index
    %12 = vector.load %arg5[%c0_10, %c0_11] : memref<2x128xf32, #tpu.memory_space<vmem>>, vector<2x128xf32>
    tpu.vector_store %arg5[%c0_10, %c0_11], %11 {strides = array<i32>} : memref<2x128xf32, #tpu.memory_space<vmem>>, vector<2x128xf32>,
    return
  }
  func.func @transform_0(%arg0: i32) -> (i32, i32) {
    %c0_i32 = arith.constant 0 : i32
    %c0_i32_0 = arith.constant 0 : i32
    return %arg0, %c0_i32 : i32, i32
  }
  func.func @transform_1(%arg0: i32) -> (i32, i32) {
    %c0_i32 = arith.constant 0 : i32
    %c0_i32_0 = arith.constant 0 : i32
    %c0_i32_1 = arith.constant 0 : i32
    return %c0_i32, %c0_i32_0 : i32, i32
  }
  func.func @transform_2(%arg0: i32) -> (i32, i32) {
    %c0_i32 = arith.constant 0 : i32
    %c0_i32_0 = arith.constant 0 : i32
    %c0_i32_1 = arith.constant 0 : i32
    return %c0_i32, %c0_i32_0 : i32, i32
  }
  func.func @transform_3(%arg0: i32) -> (i32, i32) {
    %c0_i32 = arith.constant 0 : i32
    %c0_i32_0 = arith.constant 0 : i32
    %c0_i32_1 = arith.constant 0 : i32
    return %c0_i32, %c0_i32_0 : i32, i32
  }
  func.func @transform_4(%arg0: i32) -> (i32, i32) {
    %c0_i32 = arith.constant 0 : i32
    %c0_i32_0 = arith.constant 0 : i32
    return %c0_i32, %arg0 : i32, i32
  }
}

</mosaic_0001>

<bundles_post_ra>
// kernel: tpu_custom_call.1
= control target key start
LH: loop header
LB: loop body
LE: loop exit
PB: predicated region body
PF: predicated region fallthrough
CT: control target
= control target key end

     0   :  { %9 = vsyncpa [#allocation3], 0  ;;  %s1159_s0 = inlined_call_operand.vmem [shape: f32[256,5], index: 0, kind: input, shape index: {}]   ;;  %s1160_s1 = inlined_call_operand.vmem [shape: f32[2,5], index: 1, kind: input, shape index: {}]   ;;  %s1161_s2 = inlined_call_operand.vmem [shape: f32[16,5], index: 2, kind: input, shape index: {}]   ;;  %s1162_s3 = inlined_call_operand.vmem [shape: f32[2,16], index: 3, kind: input, shape index: {}]   ;;  %s1163_s4 = inlined_call_operand.hbm [shape: f32[2,256], index: 4, kind: output, shape index: {}]  }
   0x1   :  { %11 = vsyncpa [#allocation3 + $0x1], 0  ;;  %s884_s15 = smov 0   ;;  %s886_s16 = smov 0  }
   0x2   :  { %s888_s17 = smov 0   ;;  %s890_s18 = smov 0  }
   0x3 LB: > { %s905_s19 = sadd.s32 4294967295, %s854_s18   ;;  %s587_s20 = sadd.s32 4294967294, %s854_s18   ;;  %s854_s18 = sphi %s890_s18, %s1169_s18   ;;  %s850_s17 = sphi %s888_s17, %s1168_s17   ;;  %s846_s16 = sphi %s886_s16, %s1167_s16   ;;  %s842_s15 = sphi %s884_s15, %s1166_s15  }
   0x4   : > { %s909_s21 = sadd.s32 1, %s854_s18   ;;  %s113_s22 = sadd.s32 1, %s850_s17 }
   0x5   : > { %s110_s23 = ssub.s32 %s854_s18, %s909_s21  ;;  %p123_p0 = scmp.ne.s32.totalorder %s850_s17, %s846_s16 }
   0x6   : > { %p111_p1 = scmp.eq.s32.totalorder %s110_s23, 0  ;;  %p124_p2 = scmp.eq.s32.totalorder %s905_s19, 1 }
   0x7   : > { %p129_p3 = scmp.ne.s32.totalorder %s846_s16, %s842_s15  ;;  %p130_p4 = scmp.eq.s32.totalorder %s587_s20, 1 }
   0x8   : > { %s920_s24 = scalar_select %p111_p1, %s850_s17, %s113_s22  }
   0x9   : > { %p922_p5 = por %p124_p2, %p123_p0  ;;  %p926_p6 = por %p130_p4, %p129_p3 }
   0xa   : > { %p590_p7 = scmp.ge.s32.totalorder %s854_s18, 1  ;;  %p166_p8 = scmp.lt.s32.totalorder %s854_s18, 3 }
   0xc   : > { %p167_p9 = pnand %p590_p7, %p166_p8 }
   0xd   : > { %s592_s27 = sshll.u32 (!%p167_p9), %s905_s19, 4  ;;  %s189_s14 = sand.u32 (!%p167_p9), 1, %s846_s16  }
   0xe   : > { %170 = sbr.rel (%p167_p9) target bundleno = 577 (0x241), region = 36  ;;  %p193_p10 = scmp.lt.s32.totalorder (!%p167_p9), %s592_s27, 31 }
   0xf   : > { %s591_s20 = sshll.u32 (!%p167_p9), %s189_s14, 1  ;;  %s631_s22 = sshll.u32 (!%p167_p9), %s905_s19, 5 }
  0x10   : > { %s191_s23 = scalar_lea.vmem (!%p167_p9), [#allocation2], %s591_s20  ;;  %s515_s5 = scalar_lea.sflag (!%p167_p9), [#allocation3], %s189_s14 }
  0x13   : > { %vm217_vm0 = vcmask 39936   ;;  %v215_v0 = vld [vmem:[%s1161_s2] sm:$0xff]  ;;  %s1171_s27 = smov (!%p193_p10, %s592_s27), 31  ;;  %v216_v17 = vld [vmem:[%s1161_s2 + $0x8] sm:$0xff]  ;;  %v856_v18 = vmov 0.0   ;;  %vm857_vm1 = vmmov 0  }
  0x14   : > { %704 = vmatprep.mubr.msk.f32.mxu0 %vm217_vm0, %v215_v0  ;;  %s593_s30 = sshll.u32 %s1171_s27, 3  ;;  %707 = vmatprep.subr.mxu1 %v856_v18  ;;  %v365_v34 = vld [vmem:[%s1162_s3] sm:$0x3]  ;;  %vm366_vm6 = vcmask 130048   ;;  %s528_s27 = sshll.u32 %s191_s23, 4  ;;  %s529_s27 = int_to_ptr.vmem [resolvable:$true] %s528_s27 }
  0x15   : > { %s940_s7 = scalar_lea.vmem %s1159_s0, %s593_s30  ;;  %711 = vmatprep.mubr.msk.f32.mxu1 %vm857_vm1, %v856_v18  ;;  %v214_v36 = vld [vmem:[%s1160_s1] sm:$0x3]  ;;  %s1124_s30 = scalar_lea.hbm %s1163_s4, %s631_s22 }
  0x16   : > { %v943_v1 = vld [vmem:[%s940_s7 + $0x78] sm:$0xff]  ;;  %v946_v2 = vld [vmem:[%s940_s7 + $0x70] sm:$0xff]  ;;  %v955_v3 = vld [vmem:[%s940_s7 + $0x68] sm:$0xff]  ;;  %s794_s6 = scalar_lea.vmem %s529_s27, 32 }
  0x17   : > { %672 = vmatprep.subr.msk.mxu0 %vm217_vm0, %v943_v1  ;;  %v962_v4 = vld [vmem:[%s940_s7 + $0x60] sm:$0xff]  ;;  %v969_v5 = vld [vmem:[%s940_s7 + $0x58] sm:$0xff]  ;;  %v976_v6 = vld [vmem:[%s940_s7 + $0x50] sm:$0xff]  ;;  %p795_p11 = scmp.ne.s32.totalorder %s529_s27, %s794_s6 }
  0x18   : > { %673 = vmatpush3.xpose.msk.msra.mxu0 %vm217_vm0, %v943_v1  ;;  %v983_v7 = vld [vmem:[%s940_s7 + $0x48] sm:$0xff]  ;;  %v990_v8 = vld [vmem:[%s940_s7 + $0x40] sm:$0xff]  ;;  %v997_v9 = vld [vmem:[%s940_s7 + $0x38] sm:$0xff] }
  0x19   : > { %674 = vmatprep.subr.msk.mxu0 %vm217_vm0, %v946_v2  ;;  %v1004_v10 = vld [vmem:[%s940_s7 + $0x30] sm:$0xff]  ;;  %v1011_v11 = vld [vmem:[%s940_s7 + $0x28] sm:$0xff]  ;;  %v1018_v12 = vld [vmem:[%s940_s7 + $0x20] sm:$0xff]  ;;  %p796_p12 = pnand %p795_p11, %p922_p5 }
  0x1a   : > { %v1025_v13 = vld [vmem:[%s940_s7 + $0x18] sm:$0xff]  ;;  %v1032_v14 = vld [vmem:[%s940_s7 + $0x10] sm:$0xff]  ;;  %v1039_v15 = vld [vmem:[%s940_s7 + $0x8] sm:$0xff] }
  0x1b   : > { %v1046_v16 = vld [vmem:[%s940_s7] sm:$0xff]  ;;  %p797_p13 = pneg %p796_p12  ;;  %s858_s7 = smov [#allocation2]  }
  0x1c   : > { %675 = vmatpush3.xpose.msk.msra.mxu0 %vm217_vm0, %v946_v2  ;;  %s798_s19 = sshll.u32 %s858_s7, 4  ;;  %s799_s19 = int_to_ptr.vmem [resolvable:$false] %s798_s19 }
  0x1d   : > { %676 = vmatprep.subr.msk.mxu0 %vm217_vm0, %v955_v3  ;;  %s800_s8 = scalar_lea.vmem %s799_s19, 64  ;;  %p801_p0 = scmp.lt.s32.totalorder %s529_s27, %s799_s19 }
  0x1e   : > { %p802_p1 = scmp.lt.s32.totalorder %s800_s8, %s794_s6 }
  0x20   : > { %677 = vmatpush3.xpose.msk.msra.mxu0 %vm217_vm0, %v955_v3  ;;  %p803_p2 = por %p802_p1, %p801_p0 }
  0x21   : > { %678 = vmatprep.subr.msk.mxu0 %vm217_vm0, %v962_v4 }
  0x22   : > { %p804_p3 = pnand %p803_p2, %p797_p13 }
  0x24   : > { %679 = vmatpush3.xpose.msk.msra.mxu0 %vm217_vm0, %v962_v4 }
  0x25   : > { %680 = vmatprep.subr.msk.mxu0 %vm217_vm0, %v969_v5 }
  0x28   : > { %681 = vmatpush3.xpose.msk.msra.mxu0 %vm217_vm0, %v969_v5 }
  0x29   : > { %682 = vmatprep.subr.msk.mxu0 %vm217_vm0, %v976_v6 }
  0x2c   : > { %683 = vmatpush3.xpose.msk.msra.mxu0 %vm217_vm0, %v976_v6 }
  0x2d   : > { %684 = vmatprep.subr.msk.mxu0 %vm217_vm0, %v983_v7 }
  0x30   : > { %685 = vmatpush3.xpose.msk.msra.mxu0 %vm217_vm0, %v983_v7 }
  0x31   : > { %686 = vmatprep.subr.msk.mxu0 %vm217_vm0, %v990_v8 }
  0x34   : > { %687 = vmatpush3.xpose.msk.msra.mxu0 %vm217_vm0, %v990_v8 }
  0x35   : > { %688 = vmatprep.subr.msk.mxu0 %vm217_vm0, %v997_v9 }
  0x38   : > { %689 = vmatpush3.xpose.msk.msra.mxu0 %vm217_vm0, %v997_v9 }
  0x39   : > { %690 = vmatprep.subr.msk.mxu0 %vm217_vm0, %v1004_v10 }
  0x3c   : > { %691 = vmatpush3.xpose.msk.msra.mxu0 %vm217_vm0, %v1004_v10 }
  0x3d   : > { %692 = vmatprep.subr.msk.mxu0 %vm217_vm0, %v1011_v11 }
  0x40   : > { %693 = vmatpush3.xpose.msk.msra.mxu0 %vm217_vm0, %v1011_v11 }
  0x41   : > { %694 = vmatprep.subr.msk.mxu0 %vm217_vm0, %v1018_v12 }
  0x44   : > { %695 = vmatpush3.xpose.msk.msra.mxu0 %vm217_vm0, %v1018_v12 }
  0x45   : > { %696 = vmatprep.subr.msk.mxu0 %vm217_vm0, %v1025_v13 }
  0x48   : > { %697 = vmatpush3.xpose.msk.msra.mxu0 %vm217_vm0, %v1025_v13 }
  0x49   : > { %698 = vmatprep.subr.msk.mxu0 %vm217_vm0, %v1032_v14 }
  0x4c   : > { %699 = vmatpush3.xpose.msk.msra.mxu0 %vm217_vm0, %v1032_v14 }
  0x4d   : > { %700 = vmatprep.subr.msk.mxu0 %vm217_vm0, %v1039_v15 }
  0x50   : > { %701 = vmatpush3.xpose.msk.msra.mxu0 %vm217_vm0, %v1039_v15 }
  0x51   : > { %702 = vmatprep.subr.msk.mxu0 %vm217_vm0, %v1046_v16 }
  0x54   : > { %703 = vmatpush3.xpose.msk.msra.mxu0 %vm217_vm0, %v1046_v16 }
  0x57   : > { %705 = vmatmul.mubr.msk.f32.vlgmr.msra.gmra.mxu0 %vm217_vm0, %v216_v17 }
 0x117   : > { %v706_v19 = vpop.f32.mrf.mxu0 }
 0x118   : > { %v348_v20 = vmul.f32 %v706_v19, %v706_v19 }
 0x119   : > { %v338_v21 = vpop.f32.mrf.mxu0 }
 0x11a   : > { %v350_v22 = vadd.f32 1e-06, %v348_v20  ;;  %v347_v23 = vmul.f32 %v338_v21, %v338_v21 }
 0x11c   : > { %790 = vrsqrt.f32 %v350_v22  ;;  %v349_v24 = vadd.f32 1e-06, %v347_v23  ;;  %vm360_vm2 = vcmp.eq.f32.partialorder %v350_v22, inf  ;;  %v363_v28 = vand.u32 2147483648, %v350_v22 }
 0x11d   : > { %vm362_vm3 = vcmp.eq.f32.partialorder %v350_v22, 0.0 }
 0x11e   : > { %792 = vrsqrt.f32 %v349_v24  ;;  %vm353_vm4 = vcmp.eq.f32.partialorder %v349_v24, inf  ;;  %v356_v32 = vand.u32 2147483648, %v349_v24  ;;  %vm355_vm5 = vcmp.eq.f32.partialorder %v349_v24, 0.0 }
 0x129   : > { %v791_v25 = vpop.eup %790 }
 0x12a   : > { %v359_v26 = vmul.f32 %v791_v25, %v350_v22 }
 0x12b   : > { %v793_v27 = vpop.eup %792 }
 0x12c   : > { %v361_v29 = vsel %vm360_vm2, %v350_v22, %v359_v26  ;;  %v352_v30 = vmul.f32 %v793_v27, %v349_v24 }
 0x12d   : > { %v364_v31 = vsel %vm362_vm3, %v363_v28, %v361_v29 }
 0x12e   : > { %708 = vmatpush3.msra.mxu1 %v364_v31  ;;  %v354_v33 = vsel %vm353_vm4, %v349_v24, %v352_v30 }
 0x12f   : > { %709 = vmatprep.subr.mxu1 %v856_v18  ;;  %v357_v35 = vsel %vm355_vm5, %v356_v32, %v354_v33 }
 0x130   : > { %710 = vmatpush3.msra.mxu1 %v357_v35 }
 0x131   : > { %712 = vmatmul.mubr.msk.f32.vlgmr.msra.gmra.mxu1 %vm366_vm6, %v365_v34  ;;  %714 = vmatprep.subr.mxu1 %v856_v18 }
 0x132   : > { %715 = vmatpush3.xpose.msk.msra.mxu1 %vm217_vm0, %v943_v1  ;;  %746 = vmatprep.mubr.msk.f32.mxu1 %vm857_vm1, %v856_v18 }
 0x133   : > { %716 = vmatprep.subr.mxu1 %v856_v18 }
 0x136   : > { %717 = vmatpush3.xpose.msk.msra.mxu1 %vm217_vm0, %v946_v2 }
 0x137   : > { %718 = vmatprep.subr.mxu1 %v856_v18 }
 0x13a   : > { %719 = vmatpush3.xpose.msk.msra.mxu1 %vm217_vm0, %v955_v3 }
 0x13b   : > { %720 = vmatprep.subr.mxu1 %v856_v18 }
 0x13e   : > { %721 = vmatpush3.xpose.msk.msra.mxu1 %vm217_vm0, %v962_v4 }
 0x13f   : > { %722 = vmatprep.subr.mxu1 %v856_v18 }
 0x142   : > { %723 = vmatpush3.xpose.msk.msra.mxu1 %vm217_vm0, %v969_v5 }
 0x143   : > { %724 = vmatprep.subr.mxu1 %v856_v18 }
 0x146   : > { %725 = vmatpush3.xpose.msk.msra.mxu1 %vm217_vm0, %v976_v6 }
 0x147   : > { %726 = vmatprep.subr.mxu1 %v856_v18 }
 0x14a   : > { %727 = vmatpush3.xpose.msk.msra.mxu1 %vm217_vm0, %v983_v7 }
 0x14b   : > { %728 = vmatprep.subr.mxu1 %v856_v18 }
 0x14e   : > { %729 = vmatpush3.xpose.msk.msra.mxu1 %vm217_vm0, %v990_v8 }
 0x14f   : > { %730 = vmatprep.subr.mxu1 %v856_v18 }
 0x152   : > { %731 = vmatpush3.xpose.msk.msra.mxu1 %vm217_vm0, %v997_v9 }
 0x153   : > { %732 = vmatprep.subr.mxu1 %v856_v18 }
 0x156   : > { %733 = vmatpush3.xpose.msk.msra.mxu1 %vm217_vm0, %v1004_v10 }
 0x157   : > { %734 = vmatprep.subr.mxu1 %v856_v18 }
 0x15a   : > { %735 = vmatpush3.xpose.msk.msra.mxu1 %vm217_vm0, %v1011_v11 }
 0x15b   : > { %736 = vmatprep.subr.mxu1 %v856_v18 }
 0x15e   : > { %737 = vmatpush3.xpose.msk.msra.mxu1 %vm217_vm0, %v1018_v12 }
 0x15f   : > { %738 = vmatprep.subr.mxu1 %v856_v18 }
 0x162   : > { %739 = vmatpush3.xpose.msk.msra.mxu1 %vm217_vm0, %v1025_v13 }
 0x163   : > { %740 = vmatprep.subr.mxu1 %v856_v18 }
 0x166   : > { %741 = vmatpush3.xpose.msk.msra.mxu1 %vm217_vm0, %v1032_v14 }
 0x167   : > { %742 = vmatprep.subr.mxu1 %v856_v18 }
 0x16a   : > { %743 = vmatpush3.xpose.msk.msra.mxu1 %vm217_vm0, %v1039_v15 }
 0x16b   : > { %744 = vmatprep.subr.mxu1 %v856_v18 }
 0x16e   : > { %745 = vmatpush3.xpose.msk.msra.mxu1 %vm217_vm0, %v1046_v16 }
 0x171   : > { %747 = vmatmul.mubr.msk.f32.vlgmr.msra.gmra.mxu1 %vm217_vm0, %v214_v36 }
 0x1f1   : > { %v436_v37 = vpop.f32.mrf.mxu1 }
 0x1f3   : > { %v713_v38 = vpop.f32.mrf.mxu1 }
 0x231   : > { %v509_v39 = vpop.f32.mrf.mxu1 }
 0x232   : > { %v510_v40 = vadd.f32 %v509_v39, %v436_v37 }
 0x233   : > { %v748_v41 = vpop.f32.mrf.mxu1 }
 0x234   : > { %513 = vst [vmem:[%s191_s23] sm:$0x3] %v510_v40 }
 0x235   : > { %807 = shalt.err (!%p804_p3)
}
 0x236   : > { %s808_s9 = scalar_lea.hbm %s1124_s30, 32  ;;  %s812_s12 = scalar_lea.hbm %s1163_s4, 64 }
 0x237   : > { %p809_p4 = scmp.ne.s32.totalorder %s1124_s30, %s808_s9  ;;  %p813_p9 = scmp.lt.s32.totalorder %s1124_s30, %s1163_s4 }
 0x238   : > { %p814_p10 = scmp.lt.s32.totalorder %s812_s12, %s808_s9 }
 0x239   : > { %p810_p7 = pnand %p809_p4, %p922_p5 }
 0x23a   : > { %p815_p11 = por %p814_p10, %p813_p9 }
 0x23b   : > { %p811_p8 = pneg %p810_p7 }
 0x23d   : > { %p816_p12 = pnand %p815_p11, %p811_p8 }
 0x23f   : > { %819 = shalt.err (!%p816_p12)
}
 0x240   : > { %749 = dma.vmem_to_hbm [thread:$0]  (%p922_p5), %s529_s27, 32, %s1124_s30, %s515_s5  }
 0x241 PF: > { %p755_p13 = scmp.ge.s32.totalorder %s854_s18, 2  ;;  %s540_s20 = sand.u32 1, %s842_s15  }
 0x242   : > { %s541_s22 = scalar_lea.sflag [#allocation3], %s540_s20 }
 0x243   : > { %p752_p0 = pnand %p755_p13, %p926_p6 }
 0x245   : > { %p753_p1 = pneg %p752_p0 }
 0x247   : > { %837 = dma.done.wait (%p753_p1), %s541_s22, 32  }
 0x248   : > { %839 = vsyncadd (%p753_p1), %s541_s22, 4294967264  ;;  %p14_p2 = scmp.ge.s32.totalorder %s909_s21, 4   ;;  %s1166_s15 = smov %s846_s16 }
 0x249   : > { %s1167_s16 = smov %s850_s17  ;;  %s1168_s17 = smov %s920_s24 }
 0x24a   : > { %s1169_s18 = smov %s909_s21  ;;  %16 = sbr.rel (!%p14_p2) target bundleno = 3 (0x3), region = 71 }
 0x24f   :  { %546 = vsyncpa [#allocation3], 1 }
 0x250   :  { %548 = vsyncpa [#allocation3 + $0x1], 1 }

</bundles_post_ra>
